<compile_context>
chip_gen: v7x
topology: tpu7x:2x2x1
jax: 0.10.0
libtpu: 0.0.40
codegen_flags: <defaults>
</compile_context>

<pallas_src>
import functools

import jax
import jax.numpy as jnp
from jax import lax
from jax.experimental import pallas as pl
from jax.experimental.pallas import tpu as pltpu


def _linear_attention_kernel(q_ref, k_ref, v_ref, wt_ref, b_ref, g_ref, o_ref):
    # q_ref/k_ref/v_ref: (tb, d, E) f32 (DMA'd straight from the (B, S, E)
    #                    inputs, only the first d rows of each batch)
    # wt_ref: (E, E) bf16 (pre-transposed)   b_ref: (1, E) f32
    # g_ref : (E, S) bf16 one-hot interpolate matrix
    # o_ref : (tb*d, S) f32
    tb, d, e = q_ref.shape
    rows = tb * d

    wt = wt_ref[...]
    bias = b_ref[...]
    g = g_ref[...]

    # In-kernel bf16 cast (VPU); stack the batch tile along the sublane axis so
    # the shared-Linear projection is ONE (tb*d, E) @ (E, E) MXU matmul per
    # operand with f32 accumulation (d is kept a multiple of 8, so the
    # (tb, d, E) <-> (tb*d, E) reshapes are layout-preserving).
    q2 = q_ref[...].reshape(rows, e).astype(jnp.bfloat16)
    k2 = k_ref[...].reshape(rows, e).astype(jnp.bfloat16)
    v3 = v_ref[...].astype(jnp.bfloat16)                      # (tb, d, E)

    qt = (jnp.dot(q2, wt, preferred_element_type=jnp.float32) + bias
          ).astype(jnp.bfloat16).reshape(tb, d, e)
    kt = (jnp.dot(k2, wt, preferred_element_type=jnp.float32) + bias
          ).astype(jnp.bfloat16).reshape(tb, d, e)

    # Batched scores: contract the embed axes directly (no materialized K^T).
    s = jnp.einsum("bqe,bke->bqk", qt, kt,
                   preferred_element_type=jnp.float32)        # (tb, d, d) f32
    s = s - jnp.max(s, axis=-1, keepdims=True)
    p = jnp.exp(s)                                            # f32 softmax
    inv = pl.reciprocal(jnp.sum(p, axis=-1, keepdims=True), approx=True)

    o = jnp.einsum("bqk,bke->bqe", p.astype(jnp.bfloat16), v3,
                   preferred_element_type=jnp.float32)        # (tb, d, E) f32
    o = o * inv                     # normalize the small output, not the probs

    # Fused F.interpolate(mode='nearest') on the last axis: ONE stacked
    # (tb*d, E) @ (E, S) one-hot bf16 selection matmul and ONE lane-dense
    # full-block store.
    o2 = o.reshape(rows, e).astype(jnp.bfloat16)
    o_ref[...] = jnp.dot(o2, g,
                         preferred_element_type=jnp.float32).astype(o_ref.dtype)


def _pick_batch_tile(batch, d, e, s):
    """Per-step batch tile.

    Keeps the double-buffered pipelined footprint (3 f32 inputs + f32 output)
    under ~36 MiB so it fits v7x's 64 MiB VMEM with headroom, targets stacked
    row counts <= ~1024 (tile-sweep sweet spot), prefers sublane-aligned
    tb*d, and caps tb at batch//2 so the grid has >= 2 steps for megacore.
    """
    def fits(tb):
        rows = tb * d
        return 2 * (3 * rows * e + rows * s) * 4 <= (36 << 20)

    cap = max(1, batch // 2)
    cands = [tb for tb in range(1, cap + 1) if batch % tb == 0 and fits(tb)]
    if not cands:
        return 1
    aligned = [tb for tb in cands if (tb * d) % 8 == 0]
    pool = aligned or cands
    sweet = [tb for tb in pool if tb * d <= 1024]
    return max(sweet) if sweet else min(pool)


@functools.partial(jax.jit, static_argnames=("downsample_factor", "batch_tile"))
def linear_attention(query, key, value, weight, bias, downsample_factor=4,
                     batch_tile=None):
    B, S, E = query.shape
    d = S // downsample_factor
    tb = batch_tile if batch_tile is not None else _pick_batch_tile(B, d, E, S)

    # Tiny one-time operand prep in XLA: pre-transposed bf16 weight, f32 bias
    # row, and a bf16 one-hot (E, S) matrix implementing
    # F.interpolate(mode='nearest') along the last axis (dst j reads src
    # floor(j * E / S)).
    wt = weight.T.astype(jnp.bfloat16)
    b2 = bias.reshape(1, E).astype(jnp.float32)
    idx = (jnp.arange(S) * E) // S
    gather = (jnp.arange(E)[:, None] == idx[None, :]).astype(jnp.bfloat16)

    rows_per_step = tb * d

    out2 = pl.pallas_call(
        _linear_attention_kernel,
        out_shape=jax.ShapeDtypeStruct((B * d, S), jnp.float32),
        grid_spec=pltpu.PrefetchScalarGridSpec(
            num_scalar_prefetch=0,
            grid=(B // tb,),
            in_specs=[
                # Q/K/V read directly from the original (B, S, E) tensors: the
                # (tb, d, E) block at index (i, 0, 0) DMAs only the first d
                # rows of each batch (downsampling happens in the DMA).
                pl.BlockSpec((tb, d, E), lambda i: (i, 0, 0)),
                pl.BlockSpec((tb, d, E), lambda i: (i, 0, 0)),
                pl.BlockSpec((tb, d, E), lambda i: (i, 0, 0)),
                # Grid-invariant operands (constant index_map -> fetched once).
                pl.BlockSpec((E, E), lambda i: (0, 0)),
                pl.BlockSpec((1, E), lambda i: (0, 0)),
                pl.BlockSpec((E, S), lambda i: (0, 0)),
            ],
            out_specs=pl.BlockSpec((rows_per_step, S), lambda i: (i, 0)),
        ),
        compiler_params=pltpu.CompilerParams(
            dimension_semantics=("parallel",),
            vmem_limit_bytes=48 * 1024 * 1024,
        ),
    )(query, key, value, wt, b2, gather)

    # Free metadata reshape (row-major split) back to (B, d, S).
    return out2.reshape(B, d, S)


def _reference(query, key, value, weight, bias, downsample_factor=4):
    # Pure-JAX reference mirroring the PyTorch forward with the same matmul
    # operand precision as the kernel (bf16 operands, f32 accumulation).
    B, S, E = query.shape
    d = S // downsample_factor
    bf = jnp.bfloat16
    q = query[:, :d].astype(bf)
    k = key[:, :d].astype(bf)
    v = value[:, :d].astype(bf)
    wt = weight.T.astype(bf)

    qt = (jnp.einsum("bde,ef->bdf", q, wt,
                     preferred_element_type=jnp.float32) + bias).astype(bf)
    kt = (jnp.einsum("bde,ef->bdf", k, wt,
                     preferred_element_type=jnp.float32) + bias).astype(bf)

    s = jnp.einsum("bqe,bke->bqk", qt, kt, preferred_element_type=jnp.float32)
    s = s - jnp.max(s, axis=-1, keepdims=True)
    p = jnp.exp(s)
    denom = jnp.sum(p, axis=-1, keepdims=True)
    o = jnp.einsum("bqk,bke->bqe", p.astype(bf), v,
                   preferred_element_type=jnp.float32) / denom

    # Mirror the kernel's bf16 one-hot interpolate (exact selection of bf16 o).
    o = o.astype(bf).astype(jnp.float32)
    idx = (jnp.arange(S) * E) // S
    return o[:, :, idx]


if __name__ == "__main__":
    # Small, TPU-layout-friendly shapes: d = S // 4 = 8 (sublane-aligned),
    # E = 128 (lane-dense).
    B, S, E = 4, 32, 128
    downsample_factor = 4

    root = jax.random.PRNGKey(0)
    kq, kk, kv, kw, kb = jax.random.split(root, 5)

    query = jax.random.normal(kq, (B, S, E), dtype=jnp.float32)
    key = jax.random.normal(kk, (B, S, E), dtype=jnp.float32)
    value = jax.random.normal(kv, (B, S, E), dtype=jnp.float32)

    # deterministic nn.Linear(embed_dim, embed_dim) parameters
    bound = 1.0 / (E ** 0.5)
    weight = jax.random.uniform(kw, (E, E), jnp.float32, -bound, bound)
    bias = jax.random.uniform(kb, (E,), jnp.float32, -bound, bound)

    out = linear_attention(query, key, value, weight, bias,
                           downsample_factor=downsample_factor)
    out = jax.block_until_ready(out)

    ref = _reference(query, key, value, weight, bias, downsample_factor)
    d = S // downsample_factor
    assert out.shape == (B, d, S), out.shape
    max_err = float(jnp.max(jnp.abs(out - ref)))
    assert jnp.allclose(out, ref, atol=2e-2, rtol=2e-2), max_err

    print("KERNEL_OK")
</pallas_src>

<mosaic_0001>
module attributes {stable_mosaic.version = 11 : i64} {
  func.func @_linear_attention_kernel(%arg0: i32, %arg1: memref<2x8x128xf32, #tpu.memory_space<vmem>>, %arg2: memref<2x8x128xf32, #tpu.memory_space<vmem>>, %arg3: memref<2x8x128xf32, #tpu.memory_space<vmem>>, %arg4: memref<128x128xbf16, #tpu.memory_space<vmem>>, %arg5: memref<1x128xf32, #tpu.memory_space<vmem>>, %arg6: memref<128x32xbf16, #tpu.memory_space<vmem>>, %arg7: memref<16x32xf32, #tpu.memory_space<vmem>>) attributes {dimension_semantics = [#tpu.dimension_semantics<parallel>], iteration_bounds = array<i64: 2>, scalar_prefetch = 0 : i64, scratch_operands = 0 : i64, tpu.core_type = #tpu.core_type<tc>, window_params = [{transform_indices = @transform_0, window_bounds = array<i64: 2, 8, 128>}, {transform_indices = @transform_1, window_bounds = array<i64: 2, 8, 128>}, {transform_indices = @transform_2, window_bounds = array<i64: 2, 8, 128>}, {pipeline_mode = #tpu.pipeline_mode<synchronous>, transform_indices = @transform_3, window_bounds = array<i64: 128, 128>}, {pipeline_mode = #tpu.pipeline_mode<synchronous>, transform_indices = @transform_4, window_bounds = array<i64: 1, 128>}, {pipeline_mode = #tpu.pipeline_mode<synchronous>, transform_indices = @transform_5, window_bounds = array<i64: 128, 32>}, {transform_indices = @transform_6, window_bounds = array<i64: 16, 32>}]} {
    %c0 = arith.constant 0 : index
    %c0_0 = arith.constant 0 : index
    %0 = vector.load %arg4[%c0, %c0_0] : memref<128x128xbf16, #tpu.memory_space<vmem>>, vector<128x128xbf16>
    %c0_1 = arith.constant 0 : index
    %c0_2 = arith.constant 0 : index
    %1 = vector.load %arg5[%c0_1, %c0_2] : memref<1x128xf32, #tpu.memory_space<vmem>>, vector<1x128xf32>
    %c0_3 = arith.constant 0 : index
    %c0_4 = arith.constant 0 : index
    %2 = vector.load %arg6[%c0_3, %c0_4] : memref<128x32xbf16, #tpu.memory_space<vmem>>, vector<128x32xbf16>
    %c0_5 = arith.constant 0 : index
    %c0_6 = arith.constant 0 : index
    %c0_7 = arith.constant 0 : index
    %3 = vector.load %arg1[%c0_5, %c0_6, %c0_7] : memref<2x8x128xf32, #tpu.memory_space<vmem>>, vector<2x8x128xf32>
    %4 = vector.shape_cast %3 : vector<2x8x128xf32> to vector<16x128xf32>
    %5 = arith.truncf %4 : vector<16x128xf32> to vector<16x128xbf16>
    %c0_8 = arith.constant 0 : index
    %c0_9 = arith.constant 0 : index
    %c0_10 = arith.constant 0 : index
    %6 = vector.load %arg2[%c0_8, %c0_9, %c0_10] : memref<2x8x128xf32, #tpu.memory_space<vmem>>, vector<2x8x128xf32>
    %7 = vector.shape_cast %6 : vector<2x8x128xf32> to vector<16x128xf32>
    %8 = arith.truncf %7 : vector<16x128xf32> to vector<16x128xbf16>
    %c0_11 = arith.constant 0 : index
    %c0_12 = arith.constant 0 : index
    %c0_13 = arith.constant 0 : index
    %9 = vector.load %arg3[%c0_11, %c0_12, %c0_13] : memref<2x8x128xf32, #tpu.memory_space<vmem>>, vector<2x8x128xf32>
    %10 = arith.truncf %9 : vector<2x8x128xf32> to vector<2x8x128xbf16>
    %cst = arith.constant dense<0.000000e+00> : vector<16x128xf32>
    %11 = tpu.matmul %5, %0, %cst {dimension_numbers = #tpu.dot_dimension_numbers<[1], [0], [0], [1], [0, 0, 1, 1], [], []>} : vector<16x128xbf16>, vector<128x128xbf16>, vector<16x128xf32> -> vector<16x128xf32>
    %12 = vector.broadcast %1 : vector<1x128xf32> to vector<16x128xf32>
    %13 = arith.addf %11, %12 : vector<16x128xf32>
    %14 = arith.truncf %13 : vector<16x128xf32> to vector<16x128xbf16>
    %15 = vector.shape_cast %14 : vector<16x128xbf16> to vector<2x8x128xbf16>
    %cst_14 = arith.constant dense<0.000000e+00> : vector<16x128xf32>
    %16 = tpu.matmul %8, %0, %cst_14 {dimension_numbers = #tpu.dot_dimension_numbers<[1], [0], [0], [1], [0, 0, 1, 1], [], []>} : vector<16x128xbf16>, vector<128x128xbf16>, vector<16x128xf32> -> vector<16x128xf32>
    %17 = vector.broadcast %1 : vector<1x128xf32> to vector<16x128xf32>
    %18 = arith.addf %16, %17 : vector<16x128xf32>
    %19 = arith.truncf %18 : vector<16x128xf32> to vector<16x128xbf16>
    %20 = vector.shape_cast %19 : vector<16x128xbf16> to vector<2x8x128xbf16>
    "tpu.trace_start"() <{level = 10 : i32, message = "bqe,bke->bqk"}> : () -> ()
    %cst_15 = arith.constant dense<0.000000e+00> : vector<2x8x8xf32>
    %21 = tpu.matmul %15, %20, %cst_15 {dimension_numbers = #tpu.dot_dimension_numbers<[2], [2], [1], [1], [0, 0, 0, 1, 1, 1], [0], [0]>} : vector<2x8x128xbf16>, vector<2x8x128xbf16>, vector<2x8x8xf32> -> vector<2x8x8xf32>
    "tpu.trace_stop"() : () -> ()
    %cst_16 = arith.constant dense<0xFF800000> : vector<2x8xf32>
    %22 = vector.multi_reduction <maximumf>, %21, %cst_16 [2] : vector<2x8x8xf32> to vector<2x8xf32>
    %23 = vector.shape_cast %22 : vector<2x8xf32> to vector<2x8x1xf32>
    %24 = vector.broadcast %23 : vector<2x8x1xf32> to vector<2x8x8xf32>
    %25 = arith.subf %21, %24 : vector<2x8x8xf32>
    %26 = math.exp %25 : vector<2x8x8xf32>
    %cst_17 = arith.constant dense<0.000000e+00> : vector<2x8xf32>
    %27 = vector.multi_reduction <add>, %26, %cst_17 [2] : vector<2x8x8xf32> to vector<2x8xf32>
    %28 = vector.shape_cast %27 : vector<2x8xf32> to vector<2x8x1xf32>
    %29 = tpu.reciprocal %28 {approx = true} : vector<2x8x1xf32> -> vector<2x8x1xf32>
    %30 = arith.truncf %26 : vector<2x8x8xf32> to vector<2x8x8xbf16>
    "tpu.trace_start"() <{level = 10 : i32, message = "bqk,bke->bqe"}> : () -> ()
    %cst_18 = arith.constant dense<0.000000e+00> : vector<2x8x128xf32>
    %31 = tpu.matmul %30, %10, %cst_18 {dimension_numbers = #tpu.dot_dimension_numbers<[2], [1], [1], [2], [0, 0, 0, 1, 1, 2], [0], [0]>} : vector<2x8x8xbf16>, vector<2x8x128xbf16>, vector<2x8x128xf32> -> vector<2x8x128xf32>
    "tpu.trace_stop"() : () -> ()
    %32 = vector.broadcast %29 : vector<2x8x1xf32> to vector<2x8x128xf32>
    %33 = arith.mulf %31, %32 : vector<2x8x128xf32>
    %34 = vector.shape_cast %33 : vector<2x8x128xf32> to vector<16x128xf32>
    %35 = arith.truncf %34 : vector<16x128xf32> to vector<16x128xbf16>
    %cst_19 = arith.constant dense<0.000000e+00> : vector<16x32xf32>
    %36 = tpu.matmul %35, %2, %cst_19 {dimension_numbers = #tpu.dot_dimension_numbers<[1], [0], [0], [1], [0, 0, 1, 1], [], []>} : vector<16x128xbf16>, vector<128x32xbf16>, vector<16x32xf32> -> vector<16x32xf32>
    %c0_20 = arith.constant 0 : index
    %c0_21 = arith.constant 0 : index
    %37 = vector.load %arg7[%c0_20, %c0_21] : memref<16x32xf32, #tpu.memory_space<vmem>>, vector<16x32xf32>
    tpu.vector_store %arg7[%c0_20, %c0_21], %36 {strides = array<i32>} : memref<16x32xf32, #tpu.memory_space<vmem>>, vector<16x32xf32>,
    return
  }
  func.func @transform_0(%arg0: i32) -> (i32, i32, i32) {
    %c0_i32 = arith.constant 0 : i32
    %c0_i32_0 = arith.constant 0 : i32
    %c0_i32_1 = arith.constant 0 : i32
    return %arg0, %c0_i32, %c0_i32_0 : i32, i32, i32
  }
  func.func @transform_1(%arg0: i32) -> (i32, i32, i32) {
    %c0_i32 = arith.constant 0 : i32
    %c0_i32_0 = arith.constant 0 : i32
    %c0_i32_1 = arith.constant 0 : i32
    return %arg0, %c0_i32, %c0_i32_0 : i32, i32, i32
  }
  func.func @transform_2(%arg0: i32) -> (i32, i32, i32) {
    %c0_i32 = arith.constant 0 : i32
    %c0_i32_0 = arith.constant 0 : i32
    %c0_i32_1 = arith.constant 0 : i32
    return %arg0, %c0_i32, %c0_i32_0 : i32, i32, i32
  }
  func.func @transform_3(%arg0: i32) -> (i32, i32) {
    %c0_i32 = arith.constant 0 : i32
    %c0_i32_0 = arith.constant 0 : i32
    %c0_i32_1 = arith.constant 0 : i32
    return %c0_i32, %c0_i32_0 : i32, i32
  }
  func.func @transform_4(%arg0: i32) -> (i32, i32) {
    %c0_i32 = arith.constant 0 : i32
    %c0_i32_0 = arith.constant 0 : i32
    %c0_i32_1 = arith.constant 0 : i32
    return %c0_i32, %c0_i32_0 : i32, i32
  }
  func.func @transform_5(%arg0: i32) -> (i32, i32) {
    %c0_i32 = arith.constant 0 : i32
    %c0_i32_0 = arith.constant 0 : i32
    %c0_i32_1 = arith.constant 0 : i32
    return %c0_i32, %c0_i32_0 : i32, i32
  }
  func.func @transform_6(%arg0: i32) -> (i32, i32) {
    %c0_i32 = arith.constant 0 : i32
    %c0_i32_0 = arith.constant 0 : i32
    return %arg0, %c0_i32 : i32, i32
  }
}

</mosaic_0001>

<bundles_post_ra>
// kernel: linear_attention.1
= control target key start
LH: loop header
LB: loop body
LE: loop exit
PB: predicated region body
PF: predicated region fallthrough
CT: control target
= control target key end

     0   :  { %11 = vsyncpa [#allocation5], 0  ;;  %s1681_s0 = inlined_call_operand.vmem [shape: f32[4,32,128], index: 0, kind: input, shape index: {}]   ;;  %s1682_s1 = inlined_call_operand.vmem [shape: f32[4,32,128], index: 1, kind: input, shape index: {}]   ;;  %s1683_s2 = inlined_call_operand.hbm [shape: f32[4,32,128], index: 2, kind: input, shape index: {}]   ;;  %s1684_s3 = inlined_call_operand.vmem [shape: bf16[128,128], index: 3, kind: input, shape index: {}]   ;;  %s1685_s4 = inlined_call_operand.vmem [shape: f32[1,128], index: 4, kind: input, shape index: {}]   ;;  %s1686_s5 = inlined_call_operand.vmem [shape: bf16[128,32], index: 5, kind: input, shape index: {}]   ;;  %s1687_s6 = inlined_call_operand.hbm [shape: f32[32,32], index: 6, kind: output, shape index: {}]  }
   0x1   :  { %13 = vsyncpa [#allocation5 + $0x1], 0 }
   0x2   :  { %14 = vsyncpa [#allocation6], 0 }
   0x3   :  { %16 = vsyncpa [#allocation6 + $0x1], 0  ;;  %s1395_s21 = smov 0   ;;  %s1397_s22 = smov 0  }
   0x4   :  { %s1399_s23 = smov 0   ;;  %s1401_s24 = smov 0  }
   0x5 LB: > { %s1416_s25 = sadd.s32 4294967295, %s1349_s24   ;;  %s1005_s26 = sadd.s32 4294967294, %s1349_s24   ;;  %s1349_s24 = sphi %s1401_s24, %s1700_s24   ;;  %s1345_s23 = sphi %s1399_s23, %s1699_s23   ;;  %s1341_s22 = sphi %s1397_s22, %s1698_s22   ;;  %s1337_s21 = sphi %s1395_s21, %s1697_s21  }
   0x6   : > { %s1420_s27 = sadd.s32 1, %s1349_s24   ;;  %s29_s28 = sadd.s32 1, %s1345_s23 }
   0x7   : > { %s26_s29 = ssub.s32 %s1349_s24, %s1420_s27  ;;  %p36_p0 = scmp.ne.s32.totalorder %s1345_s23, %s1341_s22 }
   0x8   : > { %p27_p1 = scmp.eq.s32.totalorder %s26_s29, 0  ;;  %p37_p2 = scmp.eq.s32.totalorder %s1349_s24, 0 }
   0x9   : > { %p94_p3 = scmp.ne.s32.totalorder %s1341_s22, %s1337_s21  ;;  %p95_p4 = scmp.eq.s32.totalorder %s1416_s25, 0 }
   0xa   : > { %s1432_s30 = scalar_select %p27_p1, %s1345_s23, %s29_s28  }
   0xb   : > { %p1434_p5 = por %p37_p2, %p36_p0  ;;  %p1438_p6 = por %p95_p4, %p94_p3 }
   0xc   : > { %p181_p7 = scmp.eq.s32.totalorder %s1416_s25, 1  ;;  %p187_p8 = scmp.eq.s32.totalorder %s1005_s26, 1 }
   0xd   : > { %p1688_p11 = scmp.ge.s32.totalorder %s1349_s24, 2 }
   0xe   : > { %p1443_p9 = por %p181_p7, %p36_p0  ;;  %p1447_p10 = por %p187_p8, %p94_p3 }
   0xf   : > { %212 = sbr.rel (%p1688_p11) target bundleno = 63 (0x3f), region = 28 }
  0x10   : > { %s1692_s9 = scalar_select %p1443_p9, 1, 0 }
  0x11   : > { %s1693_s10 = scalar_select %p1447_p10, 1, 0 }
  0x16   : > { %215 = sbr.rel (!%p1434_p5) target bundleno = 29 (0x1d), region = 32  ;;  %s217_s11 = sand.u32 (%p1434_p5), 1, %s1345_s23  }
  0x17   : > { %s1054_s12 = sshll.u32 (%p1434_p5), %s1349_s24, 6  ;;  %s1008_s13 = sshll.u32 (%p1434_p5), %s217_s11, 4 }
  0x18   : > { %s223_s16 = scalar_lea.vmem (%p1434_p5), %s1681_s0, %s1054_s12  ;;  %s219_s17 = scalar_lea.vmem (%p1434_p5), [#allocation2], %s1008_s13 }
  0x19   : > { %v253_v0 = vld [vmem:[%s223_s16] sm:$0xff] (%p1434_p5) }
  0x1a   : > { %v255_v1 = vld [vmem:[%s223_s16 + $0x20] sm:$0xff] (%p1434_p5)  ;;  %254 = vst [vmem:[%s219_s17] sm:$0xff] (%p1434_p5), %v253_v0 }
  0x1b   : > { %256 = vst [vmem:[%s219_s17 + $0x8] sm:$0xff] (%p1434_p5), %v255_v1 }
  0x1d PF: > { %262 = sbr.rel (!%p1434_p5) target bundleno = 36 (0x24), region = 70  ;;  %s264_s18 = sand.u32 (%p1434_p5), 1, %s1345_s23  }
  0x1e   : > { %s1056_s19 = sshll.u32 (%p1434_p5), %s1349_s24, 6  ;;  %s1012_s20 = sshll.u32 (%p1434_p5), %s264_s18, 4 }
  0x1f   : > { %s270_s29 = scalar_lea.vmem (%p1434_p5), %s1682_s1, %s1056_s19  ;;  %s266_s11 = scalar_lea.vmem (%p1434_p5), [#allocation3], %s1012_s20 }
  0x20   : > { %v300_v2 = vld [vmem:[%s270_s29] sm:$0xff] (%p1434_p5) }
  0x21   : > { %v302_v3 = vld [vmem:[%s270_s29 + $0x20] sm:$0xff] (%p1434_p5)  ;;  %301 = vst [vmem:[%s266_s11] sm:$0xff] (%p1434_p5), %v300_v2 }
  0x22   : > { %303 = vst [vmem:[%s266_s11 + $0x8] sm:$0xff] (%p1434_p5), %v302_v3 }
  0x24 PF: > { %s310_s12 = sand.u32 1, %s1345_s23   ;;  %s1058_s13 = sshll.u32 %s1349_s24, 10 }
  0x25   : > { %s1016_s14 = sshll.u32 %s310_s12, 4  ;;  %s1473_s17 = scalar_lea.hbm %s1683_s2, %s1058_s13 }
  0x26   : > { %s314_s18 = scalar_lea.vmem [#allocation4], %s1016_s14  ;;  %s1477_s20 = scalar_lea.sflag [#allocation5], %s310_s12 }
  0x27   : > { %s322_s19 = sshll.u32 %s314_s18, 4  ;;  %s1255_s26 = scalar_lea.hbm %s1473_s17, 256  ;;  %s1475_s19 = int_to_ptr.vmem [resolvable:$true] %s322_s19 }
  0x28   : > { %p1256_p12 = scmp.ne.s32.totalorder %s1473_s17, %s1255_s26  ;;  %s1259_s11 = scalar_lea.hbm %s1683_s2, 2048 }
  0x29   : > { %p1260_p1 = scmp.lt.u32.totalorder %s1473_s17, %s1683_s2  ;;  %p1261_p2 = scmp.lt.u32.totalorder %s1259_s11, %s1255_s26 }
  0x2a   : > { %p1257_p13 = pnand %p1256_p12, %p1434_p5  ;;  %p1263_p4 = scmp.lt.u32.totalorder %s1255_s26, %s1473_s17 }
  0x2b   : > { %p1262_p3 = por %p1261_p2, %p1260_p1 }
  0x2c   : > { %p1258_p0 = pneg %p1257_p13 }
  0x2d   : > { %p1264_p7 = por %p1263_p4, %p1262_p3 }
  0x2f   : > { %p1265_p8 = pnand %p1264_p7, %p1258_p0 }
  0x31   : > { %1268 = shalt.err (!%p1265_p8)
}
  0x32   : > { %s1269_s12 = scalar_lea.vmem %s1475_s19, 256  ;;  %s1351_s14 = smov [#allocation4]  }
  0x33   : > { %p1270_p12 = scmp.ne.s32.totalorder %s1475_s19, %s1269_s12  ;;  %s1273_s16 = sshll.u32 %s1351_s14, 4  ;;  %s1274_s16 = int_to_ptr.vmem [resolvable:$false] %s1273_s16 }
  0x34   : > { %s1275_s18 = scalar_lea.vmem %s1274_s16, 512  ;;  %p1276_p10 = scmp.lt.s32.totalorder %s1475_s19, %s1274_s16 }
  0x35   : > { %p1271_p13 = pnand %p1270_p12, %p1434_p5  ;;  %p1277_p9 = scmp.lt.s32.totalorder %s1275_s18, %s1269_s12 }
  0x37   : > { %p1272_p11 = pneg %p1271_p13  ;;  %p1278_p1 = por %p1277_p9, %p1276_p10 }
  0x39   : > { %p1279_p2 = pnand %p1278_p1, %p1272_p11 }
  0x3b   : > { %1282 = shalt.err (!%p1279_p2)
}
  0x3c   : > { %s1352_s26 = smov 512   ;;  %s1353_s28 = smov 128  }
  0x3d   : > { %s1354_s29 = smov 8  }
  0x3e   : > { %1183 = dma.hbm_to_vmem [thread:$0]  (%p1434_p5), %s1473_s17, 256, %s1475_s19, %s1477_s20, %s1352_s26, %s1353_s28, %s1354_s29  }
  0x3f PF: > { %p1020_p0 = scmp.ge.s32.totalorder %s1349_s24, 1  ;;  %p330_p3 = scmp.lt.s32.totalorder %s1349_s24, 3 }
  0x41   : > { %p331_p4 = pnand %p1020_p0, %p330_p3 }
  0x42   : > { %s1504_s11 = sand.u32 (!%p331_p4), 1, %s1341_s22  }
  0x43   : > { %334 = sbr.rel (%p331_p4) target bundleno = 1157 (0x485), region = 112  ;;  %s1507_s13 = sshll.u32 (!%p331_p4), %s1504_s11, 4 }
  0x44   : > { %s339_s7 = scalar_lea.vmem (!%p331_p4), [#allocation2], %s1507_s13  ;;  %s346_s17 = scalar_lea.vmem (!%p331_p4), [#allocation3], %s1507_s13 }
  0x45   : > { %s351_s19 = scalar_lea.sflag (!%p331_p4), [#allocation5], %s1504_s11  ;;  %s354_s20 = scalar_lea.vmem (!%p331_p4), [#allocation4], %s1507_s13 }
  0x4a   : > { %1328 = dma.done.wait (%p1438_p6), %s351_s19, 256  }
  0x4b   : > { %1330 = vsyncadd (%p1438_p6), %s351_s19, 4294967040  ;;  %v1355_v4 = vmov 0.0   ;;  %vm1356_vm0 = vmmov 0   ;;  %v1231_v5 = vld [vmem:[%s1684_s3] sm:$0xff]   ;;  %v1232_v6 = vld [vmem:[%s1684_s3 + $0x8] sm:$0xff]   ;;  %vm671_vm1 = vcmask 64512  }
  0x4c   : > { %1119 = vmatprep.subr.bf16.mxu1 %v1355_v4  ;;  %1099 = vmatprep.subr.bf16.mxu0 %v1355_v4  ;;  %v1233_v7 = vld [vmem:[%s1684_s3 + $0x10] sm:$0xff]   ;;  %v1234_v8 = vld [vmem:[%s1684_s3 + $0x18] sm:$0xff]   ;;  %v1235_v9 = vld [vmem:[%s1684_s3 + $0x20] sm:$0xff]   ;;  %vm697_vm2 = vcmask 1043456   ;;  %s390_s29 = scalar_lea.vmem [#allocation7], %s1507_s13  ;;  %s1063_s15 = sshll.u32 %s1416_s25, 8 }
  0x4d   : > { %1135 = vmatprep.mubr.msk.bf16.mxu1 %vm1356_vm0, %v1355_v4  ;;  %1115 = vmatprep.mubr.msk.bf16.mxu0 %vm1356_vm0, %v1355_v4  ;;  %v1236_v10 = vld [vmem:[%s1684_s3 + $0x28] sm:$0xff]   ;;  %v1237_v11 = vld [vmem:[%s1684_s3 + $0x30] sm:$0xff]   ;;  %v1238_v12 = vld [vmem:[%s1684_s3 + $0x38] sm:$0xff]   ;;  %s896_s19 = sshll.u32 %s390_s29, 4  ;;  %vm879_vm3 = vcmask 261120   ;;  %s1637_s8 = scalar_lea.hbm %s1687_s6, %s1063_s15  ;;  %s1632_s19 = int_to_ptr.vmem [resolvable:$true] %s896_s19 }
  0x4e   : > { %1120 = vmatpush3.bf16.msra.mxu1 %v1231_v5  ;;  %1100 = vmatpush3.bf16.msra.mxu0 %v1231_v5  ;;  %v432_v13 = vld [vmem:[%s346_s17] sm:$0xff]  ;;  %v433_v14 = vld [vmem:[%s346_s17 + $0x8] sm:$0xff]  ;;  %s883_s13 = scalar_lea.sflag [#allocation6], %s1504_s11  ;;  %s1283_s16 = scalar_lea.vmem %s1632_s19, 256 }
  0x4f   : > { %1121 = vmatprep.subr.bf16.mxu1 %v1355_v4  ;;  %1101 = vmatprep.subr.bf16.mxu0 %v1355_v4  ;;  %v429_v15 = vld [vmem:[%s339_s7] sm:$0xff]  ;;  %v430_v16 = vld [vmem:[%s339_s7 + $0x8] sm:$0xff]  ;;  %v434_v17 = vpack.c.bf16 %v433_v14, %v432_v13  ;;  %p1284_p5 = scmp.ne.s32.totalorder %s1632_s19, %s1283_s16  ;;  %p1694_p6 = scmp.ne.s32.totalorder %s1692_s9, 0 }
  0x50   : > { %v431_v18 = vpack.c.bf16 %v430_v16, %v429_v15  ;;  %v1025_v19 = vld [vmem:[%s1685_s4] ss:$0 sm:$0xff]  ;;  %v436_v54 = vld [vmem:[%s354_s20 + $0x8] sm:$0xff]  ;;  %v1241_v2 = vld [vmem:[%s1686_s5 + $0x10] sm:$0xff]   ;;  %s1357_s25 = smov [#allocation7]  }
  0x51   : > { %v435_v46 = vld [vmem:[%s354_s20] sm:$0xff]  ;;  %v438_v56 = vpack.c.bf16 %v436_v54, %v436_v54  ;;  %v1240_v1 = vld [vmem:[%s1686_s5 + $0x8] sm:$0xff]   ;;  %v1242_v3 = vld [vmem:[%s1686_s5 + $0x18] sm:$0xff]   ;;  %p1285_p9 = pnand %p1284_p5, %p1694_p6  ;;  %s1287_s18 = sshll.u32 %s1357_s25, 4  ;;  %s1288_s18 = int_to_ptr.vmem [resolvable:$false] %s1287_s18 }
  0x52   : > { %1122 = vmatpush3.bf16.msra.mxu1 %v1232_v6  ;;  %1102 = vmatpush3.bf16.msra.mxu0 %v1232_v6  ;;  %v437_v47 = vpack.c.bf16 %v435_v46, %v435_v46  ;;  %v1239_v0 = vld [vmem:[%s1686_s5] sm:$0xff]   ;;  %v1244_v6 = vld [vmem:[%s1686_s5 + $0x28] sm:$0xff]   ;;  %s1289_s7 = scalar_lea.vmem %s1288_s18, 512  ;;  %p1290_p11 = scmp.lt.s32.totalorder %s1632_s19, %s1288_s18 }
  0x53   : > { %1123 = vmatprep.subr.bf16.mxu1 %v1355_v4  ;;  %1103 = vmatprep.subr.bf16.mxu0 %v1355_v4  ;;  %v745_v60 = vsel %vm697_vm2, %v438_v56, 0  ;;  %v1243_v5 = vld [vmem:[%s1686_s5 + $0x20] sm:$0xff]   ;;  %p1286_p10 = pneg %p1285_p9  ;;  %p1291_p7 = scmp.lt.s32.totalorder %s1289_s7, %s1283_s16 }
  0x54   : > { %v699_v48 = vsel %vm697_vm2, %v437_v47, 0 }
  0x55   : > { %p1292_p8 = por %p1291_p7, %p1290_p11 }
  0x56   : > { %1124 = vmatpush3.bf16.msra.mxu1 %v1233_v7  ;;  %1104 = vmatpush3.bf16.msra.mxu0 %v1233_v7  ;;  %v1245_v7 = vld [vmem:[%s1686_s5 + $0x30] sm:$0xff]  }
  0x57   : > { %1125 = vmatprep.subr.bf16.mxu1 %v1355_v4  ;;  %1105 = vmatprep.subr.bf16.mxu0 %v1355_v4  ;;  %p1293_p12 = pnand %p1292_p8, %p1286_p10 }
  0x5a   : > { %1126 = vmatpush3.bf16.msra.mxu1 %v1234_v8  ;;  %1106 = vmatpush3.bf16.msra.mxu0 %v1234_v8  ;;  %v1246_v8 = vld [vmem:[%s1686_s5 + $0x38] sm:$0xff]  }
  0x5b   : > { %1127 = vmatprep.subr.bf16.mxu1 %v1355_v4  ;;  %1107 = vmatprep.subr.bf16.mxu0 %v1355_v4 }
  0x5e   : > { %1128 = vmatpush3.bf16.msra.mxu1 %v1235_v9  ;;  %1108 = vmatpush3.bf16.msra.mxu0 %v1235_v9 }
  0x5f   : > { %1129 = vmatprep.subr.bf16.mxu1 %v1355_v4  ;;  %1109 = vmatprep.subr.bf16.mxu0 %v1355_v4 }
  0x62   : > { %1130 = vmatpush3.bf16.msra.mxu1 %v1236_v10  ;;  %1110 = vmatpush3.bf16.msra.mxu0 %v1236_v10 }
  0x63   : > { %1131 = vmatprep.subr.bf16.mxu1 %v1355_v4  ;;  %1111 = vmatprep.subr.bf16.mxu0 %v1355_v4 }
  0x66   : > { %1132 = vmatpush3.bf16.msra.mxu1 %v1237_v11  ;;  %1112 = vmatpush3.bf16.msra.mxu0 %v1237_v11 }
  0x67   : > { %1133 = vmatprep.subr.bf16.mxu1 %v1355_v4  ;;  %1113 = vmatprep.subr.bf16.mxu0 %v1355_v4 }
  0x6a   : > { %1134 = vmatpush3.bf16.msra.mxu1 %v1238_v12  ;;  %1114 = vmatpush3.bf16.msra.mxu0 %v1238_v12 }
  0x6b   : > { %1139 = vmatprep.subr.bf16.mxu1 %v1355_v4  ;;  %1163 = vmatprep.subr.bf16.mxu0 %v1355_v4 }
  0x6d   : > { %1136 = vmatmul.mubr.bf16.vlgmr.msra.gmra.mrb[0].mxu1 %v434_v17  ;;  %1116 = vmatmul.mubr.bf16.vlgmr.msra.gmra.mrb[0].mxu0 %v431_v18 }
  0x6e   : > { %1141 = vmatprep.mubr.msk.bf16.mxu1 %vm1356_vm0, %v1355_v4  ;;  %1179 = vmatprep.mubr.msk.bf16.mxu0 %vm1356_vm0, %v1355_v4 }
  0x6f   : > { %1164 = vmatpush3.bf16.msra.mxu0 %v1239_v0 }
  0x70   : > { %1165 = vmatprep.subr.bf16.mxu0 %v1355_v4 }
  0x73   : > { %1166 = vmatpush3.bf16.msra.mxu0 %v1240_v1 }
  0x74   : > { %1167 = vmatprep.subr.bf16.mxu0 %v1355_v4 }
  0x77   : > { %1168 = vmatpush3.bf16.msra.mxu0 %v1241_v2 }
  0x78   : > { %1169 = vmatprep.subr.bf16.mxu0 %v1355_v4 }
  0x7b   : > { %1170 = vmatpush3.bf16.msra.mxu0 %v1242_v3 }
  0x7c   : > { %1171 = vmatprep.subr.bf16.mxu0 %v1355_v4 }
  0x7f   : > { %1172 = vmatpush3.bf16.msra.mxu0 %v1243_v5 }
  0x80   : > { %1173 = vmatprep.subr.bf16.mxu0 %v1355_v4 }
  0x83   : > { %1174 = vmatpush3.bf16.msra.mxu0 %v1244_v6 }
  0x84   : > { %1175 = vmatprep.subr.bf16.mxu0 %v1355_v4 }
  0x87   : > { %1176 = vmatpush3.bf16.msra.mxu0 %v1245_v7 }
  0x88   : > { %1177 = vmatprep.subr.bf16.mxu0 %v1355_v4 }
  0x8b   : > { %1178 = vmatpush3.bf16.msra.mxu0 %v1246_v8 }
 0x140   : > { %v576_v20 = vpop.f32.mrb[0].mxu1  ;;  %v527_v21 = vpop.f32.mrb[0].mxu0 }
 0x141   : > { %v577_v22 = vadd.f32 %v1025_v19, %v576_v20  ;;  %v1137_v23 = vpop.f32.mrb[1].mxu1  ;;  %v1117_v24 = vpop.f32.mrb[1].mxu0  ;;  %v528_v30 = vadd.f32 %v1025_v19, %v527_v21 }
 0x142   : > { %v579_v25 = vpop.f32.mrb[2].mxu1  ;;  %v530_v26 = vpop.f32.mrb[2].mxu0 }
 0x143   : > { %v1061_v27 = vpack.c.bf16 %v577_v22, %v577_v22  ;;  %v1138_v28 = vpop.f32.mrb[3].mxu1  ;;  %v1118_v29 = vpop.f32.mrb[3].mxu0  ;;  %v580_v31 = vadd.f32 %v1025_v19, %v579_v25  ;;  %v1059_v32 = vpack.c.bf16 %v528_v30, %v528_v30  ;;  %v531_v34 = vadd.f32 %v1025_v19, %v530_v26 }
 0x145   : > { %1140 = vmatpush3.bf16.xpose.msra.mxu1 %v1061_v27  ;;  %v1062_v33 = vpack.c.bf16 %v580_v31, %v580_v31  ;;  %v1060_v35 = vpack.c.bf16 %v531_v34, %v531_v34 }
 0x146   : > { %1145 = vmatprep.subr.bf16.mxu1 %v1355_v4 }
 0x14c   : > { %1142 = vmatmul.mubr.bf16.vlgmr.msra.gmra.mrb[4].mxu1 %v1059_v32 }
 0x14d   : > { %1146 = vmatpush3.bf16.xpose.msra.mxu1 %v1062_v33  ;;  %1147 = vmatprep.mubr.msk.bf16.mxu1 %vm1356_vm0, %v1355_v4 }
 0x14e   : > { %1151 = vmatprep.subr.bf16.mxu1 %v1355_v4 }
 0x154   : > { %1148 = vmatmul.mubr.bf16.vlgmr.msra.gmra.mrb[8].mxu1 %v1060_v35 }
 0x155   : > { %1153 = vmatprep.mubr.msk.bf16.mxu1 %vm1356_vm0, %v1355_v4  ;;  %1152 = vmatpush3.bf16.msra.mxu1 %v699_v48 }
 0x156   : > { %1157 = vmatprep.subr.bf16.mxu1 %v1355_v4 }
 0x21f   : > { %v625_v36 = vpop.f32.mrb[4].mxu1 }
 0x220   : > { %v1143_v37 = vpop.f32.mrb[5].mxu1  ;;  %v672_v38 = vsel %vm671_vm1, %v625_v36, -inf }
 0x221   : > { %673 = vmax.xlane.f32.xlu0 %v672_v38  ;;  %v628_v39 = vpop.f32.mrb[6].mxu1 }
 0x222   : > { %v1144_v40 = vpop.f32.mrb[7].mxu1 }
 0x227   : > { %v665_v41 = vpop.f32.mrb[8].mxu1 }
 0x228   : > { %v1149_v42 = vpop.f32.mrb[9].mxu1  ;;  %v675_v43 = vsel %vm671_vm1, %v665_v41, -inf }
 0x229   : > { %676 = vmax.xlane.f32.xlu0 %v675_v43  ;;  %v668_v44 = vpop.f32.mrb[10].mxu1 }
 0x22a   : > { %v1150_v45 = vpop.f32.mrb[11].mxu1 }
 0x2ae   : > { %v674_v49 = vpop.xlane.xlu0 %673 }
 0x2af   : > { %v678_v50 = vsub.f32 %v625_v36, %v674_v49 }
 0x2b1   : > { %v680_v51 = vmul.f32 1.442695, %v678_v50 }
 0x2b3   : > { %1247 = vpow2.f32 %v680_v51 }
 0x2b6   : > { %v677_v52 = vpop.xlane.xlu0 %676 }
 0x2b7   : > { %v679_v53 = vsub.f32 %v665_v41, %v677_v52 }
 0x2b9   : > { %v682_v55 = vmul.f32 1.442695, %v679_v53 }
 0x2bb   : > { %1249 = vpow2.f32 %v682_v55 }
 0x2bd   : > { %v1248_v57 = vpop.eup %1247 }
 0x2be   : > { %v684_v58 = vsel %vm671_vm1, %v1248_v57, 0.0  ;;  %v692_v59 = vpack.c.bf16 %v1248_v57, %v1248_v57 }
 0x2bf   : > { %685 = vadd.xlane.f32.xlu1 %v684_v58 }
 0x2c0   : > { %1154 = vmatmul.mubr.msk.bf16.vlgmr.msra.gmra.mrb[12].mxu1 %vm671_vm1, %v692_v59 }
 0x2c1   : > { %1158 = vmatpush3.bf16.msra.mxu1 %v745_v60  ;;  %1159 = vmatprep.mubr.msk.bf16.mxu1 %vm1356_vm0, %v1355_v4 }
 0x2c5   : > { %v1250_v61 = vpop.eup %1249 }
 0x2c6   : > { %v687_v62 = vsel %vm671_vm1, %v1250_v61, 0.0  ;;  %v693_v63 = vpack.c.bf16 %v1250_v61, %v1250_v61 }
 0x2c7   : > { %688 = vadd.xlane.f32.xlu1 %v687_v62 }
 0x2c8   : > { %1160 = vmatmul.mubr.msk.bf16.vlgmr.msra.gmra.mrb[16].mxu1 %vm671_vm1, %v693_v63 }
 0x34c   : > { %v686_v9 = vpop.xlane.xlu1 %685 }
 0x34d   : > { %1251 = vrcp.f32 %v686_v9 }
 0x354   : > { %v689_v10 = vpop.xlane.xlu1 %688 }
 0x355   : > { %1253 = vrcp.f32 %v689_v10 }
 0x357   : > { %v1252_v15 = vpop.eup %1251 }
 0x35f   : > { %v1254_v16 = vpop.eup %1253 }
 0x393   : > { %v735_v11 = vpop.f32.mrb[12].mxu1 }
 0x394   : > { %v1155_v12 = vpop.f32.mrb[13].mxu1  ;;  %v787_v18 = vmul.f32 %v1252_v15, %v735_v11 }
 0x395   : > { %v738_v13 = vpop.f32.mrb[14].mxu1 }
 0x396   : > { %v1156_v14 = vpop.f32.mrb[15].mxu1 }
 0x39b   : > { %v781_v17 = vpop.f32.mrb[16].mxu1 }
 0x39c   : > { %v788_v4 = vmul.f32 %v1254_v16, %v781_v17  ;;  %v1161_v19 = vpop.f32.mrb[17].mxu1 }
 0x39d   : > { %v784_v20 = vpop.f32.mrb[18].mxu1 }
 0x39e   : > { %v789_v21 = vpack.c.bf16 %v788_v4, %v787_v18  ;;  %v1162_v22 = vpop.f32.mrb[19].mxu1 }
 0x3a0   : > { %1180 = vmatmul.mubr.bf16.vlgmr.msra.gmra.mrb[4].mxu0 %v789_v21 }
 0x473   : > { %v872_v23 = vpop.f32.mrb[4].mxu0 }
 0x474   : > { %880 = vst.msk [vmem:[%s390_s29] sm:$0xff] %vm879_vm3, %v872_v23  ;;  %v1181_v24 = vpop.f32.mrb[5].mxu0 }
 0x475   : > { %v875_v25 = vpop.f32.mrb[6].mxu0 }
 0x476   : > { %881 = vst.msk [vmem:[%s390_s29 + $0x8] sm:$0xff] %vm879_vm3, %v875_v25  ;;  %v1182_v26 = vpop.f32.mrb[7].mxu0 }
 0x477   : > { %1296 = shalt.err (!%p1293_p12)
}
 0x478   : > { %s1297_s17 = scalar_lea.hbm %s1637_s8, 256  ;;  %s1301_s28 = scalar_lea.hbm %s1687_s6, 512 }
 0x479   : > { %p1298_p13 = scmp.ne.s32.totalorder %s1637_s8, %s1297_s17  ;;  %p1302_p0 = scmp.lt.u32.totalorder %s1637_s8, %s1687_s6 }
 0x47a   : > { %p1303_p3 = scmp.lt.u32.totalorder %s1301_s28, %s1297_s17  ;;  %p1305_p5 = scmp.lt.u32.totalorder %s1297_s17, %s1637_s8 }
 0x47b   : > { %p1299_p1 = pnand %p1298_p13, %p1694_p6 }
 0x47c   : > { %p1304_p4 = por %p1303_p3, %p1302_p0 }
 0x47d   : > { %p1300_p2 = pneg %p1299_p1 }
 0x47e   : > { %p1306_p9 = por %p1305_p5, %p1304_p4 }
 0x480   : > { %p1307_p10 = pnand %p1306_p9, %p1300_p2 }
 0x482   : > { %1310 = shalt.err (!%p1307_p10)
}
 0x483   : > { %s1358_s12 = smov 128   ;;  %s1359_s14 = smov 8  }
 0x484   : > { %1185 = dma.vmem_to_hbm [thread:$0]  (%p1694_p6), %s1632_s19, 256, %s1637_s8, %s883_s13, %s1358_s12, %s1358_s12, %s1359_s14  }
 0x485 PF: > { %s911_s16 = sand.u32 1, %s1337_s21   ;;  %p1695_p11 = scmp.ne.s32.totalorder %s1693_s10, 0 }
 0x486   : > { %p1696_p7 = scmp.ge.s32.totalorder %s1349_s24, 2  ;;  %s912_s25 = scalar_lea.sflag [#allocation6], %s911_s16 }
 0x488   : > { %p1188_p8 = pnand %p1696_p7, %p1695_p11 }
 0x48a   : > { %1332 = dma.done.wait (!%p1188_p8), %s912_s25, 256  }
 0x48b   : > { %1334 = vsyncadd (!%p1188_p8), %s912_s25, 4294967040  ;;  %p19_p12 = scmp.ge.s32.totalorder %s1420_s27, 4   ;;  %s1697_s21 = smov %s1341_s22 }
 0x48c   : > { %s1698_s22 = smov %s1345_s23  ;;  %s1699_s23 = smov %s1432_s30 }
 0x48d   : > { %s1700_s24 = smov %s1420_s27  ;;  %21 = sbr.rel (!%p19_p12) target bundleno = 5 (0x5), region = 181 }
 0x494   :  { %917 = vsyncpa [#allocation5], 1 }
 0x495   :  { %919 = vsyncpa [#allocation5 + $0x1], 1 }
 0x496   :  { %920 = vsyncpa [#allocation6], 1 }
 0x497   :  { %922 = vsyncpa [#allocation6 + $0x1], 1 }

</bundles_post_ra>
